<compile_context>
chip_gen: v6e
topology: v6e:2x2x1
jax: 0.10.0
libtpu: 0.0.40
codegen_flags: <defaults>
</compile_context>

<pallas_src>
import functools

import jax
import jax.numpy as jnp
from jax.experimental import pallas as pl
from jax.experimental.pallas import tpu as pltpu


# ----------------------------------------------------------------------------
# Kernels
# ----------------------------------------------------------------------------

def _single_pass_kernel(x_ref, o_ref):
    """Whole tensor resident in VMEM: read once, reduce, scale, write (2N HBM)."""
    x = x_ref[...].astype(jnp.float32)
    total = jnp.sum(x * x)
    inv = jax.lax.rsqrt(total)                       # EUP rsqrt, O(1)
    o_ref[...] = (x * inv).astype(o_ref.dtype)


def _partial_sumsq_kernel(x_ref, p_ref):
    """Per-tile sum of squares folded to an (8, c) per-lane slab (VPU adds only)."""
    x = x_ref[...].astype(jnp.float32)
    xx = x * x
    r, c = xx.shape                                  # r % 8 == 0 by construction
    p_ref[...] = xx.reshape(r // 8, 8, c).sum(axis=0).reshape(1, 8, c)


def _scale_kernel(inv_ref, x_ref, o_ref):
    """out = x * (1/||x||_F); inv is a precomputed (1, 1) scalar block."""
    o_ref[...] = (x_ref[...].astype(jnp.float32) * inv_ref[...]).astype(o_ref.dtype)


# ----------------------------------------------------------------------------
# Planning helpers (all trace-time / Python-level)
# ----------------------------------------------------------------------------

@functools.lru_cache(maxsize=None)
def _vmem_limit_bytes():
    """Generation-aware scoped-VMEM budget (v7x: 64 MiB physical, v5e/v6e: 128 MiB)."""
    default_capacity = 64 * 1024 * 1024              # v7x-safe fallback
    try:
        capacity = int(pltpu.get_tpu_info().vmem_capacity_bytes)
        if capacity <= 0:
            capacity = default_capacity
    except Exception:
        capacity = default_capacity
    # Leave headroom for Mosaic internal scratch / semaphores.
    return max(32 * 1024 * 1024,
               min(capacity - 16 * 1024 * 1024, (capacity * 3) // 4))


def _largest_row_block(rows, upper):
    """Largest multiple-of-8 divisor of `rows` that is <= upper (rows % 8 == 0)."""
    upper = min(upper, rows)
    upper -= upper % 8
    for bs in range(upper, 7, -8):
        if rows % bs == 0:
            return bs
    return 8


# ----------------------------------------------------------------------------
# Public wrapper
# ----------------------------------------------------------------------------

@functools.partial(jax.jit, static_argnames=("force_two_pass", "max_block_rows"))
def frobenius_normalize(x, *, force_two_pass=False, max_block_rows=None):
    orig_shape = x.shape
    out_dtype = x.dtype
    n = x.size
    if n == 0:
        return x
    itemsize = jnp.dtype(x.dtype).itemsize
    limit = _vmem_limit_bytes()

    # ---- lane-dense 2-D view; avoid pad copies whenever numel allows ----
    c = None
    needs_pad = False
    for cand in (1024, 512, 256, 128):
        if n % (8 * cand) == 0:
            c, rows = cand, n // cand
            break
    if c is None:
        # Genuinely ragged numel -> zero-pad fallback (zeros are inert for sum(x*x)).
        # TODO(synk): mask the tail in-kernel (scalar-prefetched count + iota) to
        # avoid the pad/slice copies for ragged sizes.
        c = 512
        rows = ((-(-n // c)) + 7) // 8 * 8
        needs_pad = True

    # ---- single-pass (VMEM-resident, 2N traffic) vs streaming (3N) decision ----
    compute_bytes = rows * c * 4                     # f32 working set
    single_pass = (not force_two_pass) and (compute_bytes * 5 <= limit)

    if single_pass:
        block_rows = rows
        n_tiles = 1
    else:
        # Double-buffered in + out blocks must sit well under the scoped limit.
        target_block_bytes = max(1 << 20, limit // 6)
        target_rows = max(8, (target_block_bytes // (c * itemsize)) // 8 * 8)
        if max_block_rows is not None:
            target_rows = max(8, (min(target_rows, max_block_rows) // 8) * 8)
        if rows <= target_rows:
            block_rows = rows
        else:
            block_rows = 0
            if not needs_pad:
                block_rows = _largest_row_block(rows, target_rows)
            if block_rows * 8 < target_rows:
                # Ragged numel (or only tiny divisors): pad rows to keep blocks big.
                needs_pad = True
                block_rows = target_rows
                rows = ((rows + block_rows - 1) // block_rows) * block_rows
        n_tiles = rows // block_rows

    padded_n = rows * c
    flat = x.reshape(-1)
    if padded_n != n:
        flat = jnp.pad(flat, (0, padded_n - n))      # zeros are inert for sum(x*x)
    x2d = flat.reshape(rows, c)

    if single_pass:
        out2d = pl.pallas_call(
            _single_pass_kernel,
            out_shape=jax.ShapeDtypeStruct((rows, c), out_dtype),
            compiler_params=pltpu.CompilerParams(vmem_limit_bytes=limit),
        )(x2d)
    else:
        # Pass 1: per-tile partial sums of squares (tile axis "parallel" -> megacore).
        partials = pl.pallas_call(
            _partial_sumsq_kernel,
            out_shape=jax.ShapeDtypeStruct((n_tiles, 8, c), jnp.float32),
            grid_spec=pltpu.PrefetchScalarGridSpec(
                num_scalar_prefetch=0,
                grid=(n_tiles,),
                in_specs=[pl.BlockSpec((block_rows, c), lambda i: (i, 0))],
                out_specs=pl.BlockSpec((1, 8, c), lambda i: (i, 0, 0)),
            ),
            compiler_params=pltpu.CompilerParams(
                dimension_semantics=("parallel",),
                vmem_limit_bytes=limit,
            ),
        )(x2d)

        # Tiny combine + rsqrt outside the kernel (negligible vs N-sized streams).
        inv = jax.lax.rsqrt(jnp.sum(partials, dtype=jnp.float32)).reshape(1, 1)

        # Pass 2: scale every tile by the precomputed inverse norm ("parallel").
        out2d = pl.pallas_call(
            _scale_kernel,
            out_shape=jax.ShapeDtypeStruct((rows, c), out_dtype),
            grid_spec=pltpu.PrefetchScalarGridSpec(
                num_scalar_prefetch=0,
                grid=(n_tiles,),
                in_specs=[pl.BlockSpec((1, 1), lambda i: (0, 0)),
                          pl.BlockSpec((block_rows, c), lambda i: (i, 0))],
                out_specs=pl.BlockSpec((block_rows, c), lambda i: (i, 0)),
            ),
            compiler_params=pltpu.CompilerParams(
                dimension_semantics=("parallel",),
                vmem_limit_bytes=limit,
            ),
        )(inv, x2d)

    out_flat = out2d.reshape(-1)
    if padded_n != n:
        out_flat = out_flat[:n]
    return out_flat.reshape(orig_shape)


if __name__ == "__main__":
    key = jax.random.PRNGKey(0)

    # Main check: shape implied by the module's forward (NCHW float tensor).
    x = jax.random.normal(key, (2, 4, 16, 16), dtype=jnp.float32)
    out = jax.block_until_ready(frobenius_normalize(x))
    ref = x / jnp.sqrt(jnp.sum(x.astype(jnp.float32) ** 2))
    assert out.shape == x.shape and out.dtype == x.dtype
    assert jnp.allclose(out, ref, rtol=1e-5, atol=1e-6), "mismatch vs reference"

    # Ragged numel: exercises the zero-pad fallback (still single-pass).
    x2 = jax.random.normal(jax.random.PRNGKey(1), (3, 5, 37, 29), dtype=jnp.float32)
    out2 = jax.block_until_ready(frobenius_normalize(x2))
    ref2 = x2 / jnp.sqrt(jnp.sum(x2 ** 2))
    assert jnp.allclose(out2, ref2, rtol=1e-5, atol=1e-6), "mismatch (ragged)"

    # Force the streaming two-kernel ("parallel"/megacore) path with small blocks.
    x3 = jax.random.normal(jax.random.PRNGKey(2), (8, 16, 64, 64), dtype=jnp.float32)
    out3 = jax.block_until_ready(
        frobenius_normalize(x3, force_two_pass=True, max_block_rows=64))
    ref3 = x3 / jnp.sqrt(jnp.sum(x3 ** 2))
    assert jnp.allclose(out3, ref3, rtol=1e-5, atol=1e-6), "mismatch (streaming)"

    print("KERNEL_OK")
</pallas_src>

<mosaic_0001>
module attributes {stable_mosaic.version = 11 : i64} {
  func.func @_single_pass_kernel(%arg0: memref<8x256xf32, #tpu.memory_space<vmem>>, %arg1: memref<8x256xf32, #tpu.memory_space<vmem>>) attributes {dimension_semantics = [], scalar_prefetch = 0 : i64, scratch_operands = 0 : i64, tpu.core_type = #tpu.core_type<tc>} {
    %c0 = arith.constant 0 : index
    %c0_0 = arith.constant 0 : index
    %0 = vector.load %arg0[%c0, %c0_0] : memref<8x256xf32, #tpu.memory_space<vmem>>, vector<8x256xf32>
    %1 = arith.mulf %0, %0 : vector<8x256xf32>
    %2 = vector.shape_cast %1 : vector<8x256xf32> to vector<1x8x256xf32>
    %cst = arith.constant dense<0.000000e+00> : vector<1xf32>
    %3 = vector.multi_reduction <add>, %2, %cst [1, 2] : vector<1x8x256xf32> to vector<1xf32>
    %4 = vector.shape_cast %3 : vector<1xf32> to vector<1x1x1xf32>
    %5 = vector.extract %4[0, 0, 0] : f32 from vector<1x1x1xf32>
    %6 = math.rsqrt %5 : f32
    %7 = vector.broadcast %6 : f32 to vector<8x256xf32>
    %8 = arith.mulf %0, %7 : vector<8x256xf32>
    %c0_1 = arith.constant 0 : index
    %c0_2 = arith.constant 0 : index
    %9 = vector.load %arg1[%c0_1, %c0_2] : memref<8x256xf32, #tpu.memory_space<vmem>>, vector<8x256xf32>
    tpu.vector_store %arg1[%c0_1, %c0_2], %8 {strides = array<i32>} : memref<8x256xf32, #tpu.memory_space<vmem>>, vector<8x256xf32>,
    return
  }
}

</mosaic_0001>

<bundles_post_ra>
// kernel: frobenius_normalize.1
= control target key start
LH: loop header
LB: loop body
LE: loop exit
PB: predicated region body
PF: predicated region fallthrough
CT: control target
= control target key end

     0   :  { %s62_s0 = inlined_call_operand.vmem [shape: f32[8,256], index: 0, kind: input, shape index: {}]   ;;  %s63_s1 = inlined_call_operand.vmem [shape: f32[8,256], index: 1, kind: output, shape index: {}]  }
   0x1   :  { %v8_v0 = vld [vmem:[%s62_s0] sm:$0xff]  ;;  %v9_v1 = vld [vmem:[%s62_s0 + $0x8] sm:$0xff] }
   0x2   :  { %v10_v2 = vmul.f32 %v8_v0, %v8_v0  ;;  %v11_v3 = vmul.f32 %v9_v1, %v9_v1 }
   0x4   :  { %v12_v4 = vadd.f32 %v11_v3, %v10_v2 }
   0x6   :  { %13 = vadd.xlane.f32.xlu0 %v12_v4 }
  0x8f   :  { %v14_v5 = vpop.xlane.xlu0 %13 }
  0x90   :  { %v15_v6 = vrot.slane %v14_v5, 4 }
  0x92   :  { %v16_v7 = vadd.f32 %v15_v6, %v14_v5 }
  0x94   :  { %v17_v8 = vrot.slane %v16_v7, 2 }
  0x96   :  { %v18_v9 = vadd.f32 %v17_v8, %v16_v7 }
  0x98   :  { %v19_v10 = vrot.slane %v18_v9, 1 }
  0x9a   :  { %v20_v11 = vadd.f32 %v19_v10, %v18_v9 }
  0x9c   :  { %34 = vpush %v20_v11 }
  0xcd   :  { %s35_s10 = spop %34 }
  0xce   :  { %v22_v12 = vstv %s35_s10 }
  0xcf   :  { %38 = vrsqrt.f32 %v22_v12 }
  0xdc   :  { %v39_v13 = vpop.eup %38 }
  0xdd   :  { %36 = vpush %v39_v13 }
 0x10e   :  { %s37_s11 = spop %36 }
 0x10f   :  { %v25_v14 = vstv %s37_s11 }
 0x110   :  { %v26_v15 = vmul.f32 %v25_v14, %v8_v0  ;;  %v27_v16 = vmul.f32 %v25_v14, %v9_v1 }
 0x112   :  { %28 = vst [vmem:[%s63_s1] sm:$0xff] %v26_v15  ;;  %29 = vst [vmem:[%s63_s1 + $0x8] sm:$0xff] %v27_v16 }

</bundles_post_ra>
